<compile_context>
chip_gen: v7x
topology: tpu7x:2x2x1
jax: 0.10.0
libtpu: 0.0.40
codegen_flags: <defaults>
</compile_context>

<pallas_src>
import functools

import jax
import jax.numpy as jnp
from jax import lax
from jax.experimental import pallas as pl
from jax.experimental.pallas import tpu as pltpu


# Contract last dim of x (tm, tk) with last dim of w (tn, tk) -> (tm, tn),
# i.e. x @ w.T without materializing any transpose.
_CONTRACT_LAST = (((1,), (1,)), ((), ()))

_TM_CAP = 512   # batch tile cap
_TN_CAP = 512   # out-features tile cap
_TK_CAP = 1024  # in-features (reduction) tile cap


def _round_up(v, m):
    return -(-v // m) * m


def _tile_and_pad(dim, cap):
    """Full-extent block if the dim fits under the cap (always legal w.r.t.
    the (8,128) rule); otherwise a cap-sized tile and the dim padded up."""
    if dim <= cap:
        return dim, dim
    return cap, _round_up(dim, cap)


def _pad_axis(a, axis, target):
    if a.shape[axis] == target:
        return a
    widths = [(0, 0)] * a.ndim
    widths[axis] = (0, target - a.shape[axis])
    return jnp.pad(a, widths)


def _vmem_limit(nbytes):
    # Leave headroom under the 64 MiB v7x per-core VMEM.
    return min(56 << 20, max(32 << 20, int(nbytes * 1.5)))


# ---------------------------------------------------------------------------
# Factorized-noise kernels (module default).
# ---------------------------------------------------------------------------
def _factorized_fused_kernel(x_ref, lw_ref, w_ref, in_n_ref, out_n_ref,
                             cbias_ref, o_ref, acc_ref):
    """Single-dot fusion (used when tm >= 256):
       combined = lw + (w * input_noise_row) * output_noise_col
       acc     += x @ combined.T
    x_ref    : (tm, tk)    lw_ref/w_ref : (tn, tk)   native (Out, In) layout
    in_n_ref : (1, tk)     out_n_ref    : (tn, 1)    cbias_ref : (1, tn)
    acc_ref  : (tm, tn) f32 VMEM scratch
    """
    k = pl.program_id(2)

    @pl.when(k == 0)
    def _():
        acc_ref[...] = jnp.zeros_like(acc_ref)

    combined = lw_ref[...] + (w_ref[...] * in_n_ref[...]) * out_n_ref[...]
    acc_ref[...] += lax.dot_general(
        x_ref[...], combined, _CONTRACT_LAST, preferred_element_type=jnp.float32)

    @pl.when(k == pl.num_programs(2) - 1)
    def _():
        o_ref[...] = (acc_ref[...] + cbias_ref[...]).astype(o_ref.dtype)


def _factorized_split_kernel(x_ref, lw_ref, w_ref, in_n_ref, out_n_ref,
                             cbias_ref, o_ref, acc_lin_ref, acc_noisy_ref):
    """Two-accumulator form (small tm): the noisy branch is
       ((x * input_noise) @ weight.T) * output_noise  (scale in epilogue).
    out_n_ref here is a (1, tn) row (f32)."""
    k = pl.program_id(2)

    @pl.when(k == 0)
    def _():
        acc_lin_ref[...] = jnp.zeros_like(acc_lin_ref)
        acc_noisy_ref[...] = jnp.zeros_like(acc_noisy_ref)

    x = x_ref[...]
    acc_lin_ref[...] += lax.dot_general(
        x, lw_ref[...], _CONTRACT_LAST, preferred_element_type=jnp.float32)

    xn = x * in_n_ref[...]
    acc_noisy_ref[...] += lax.dot_general(
        xn, w_ref[...], _CONTRACT_LAST, preferred_element_type=jnp.float32)

    @pl.when(k == pl.num_programs(2) - 1)
    def _():
        out = (acc_lin_ref[...]
               + acc_noisy_ref[...] * out_n_ref[...]
               + cbias_ref[...])
        o_ref[...] = out.astype(o_ref.dtype)


@functools.partial(jax.jit, static_argnames=("stream_dtype",))
def noisy_linear_forward(x, linear_w, linear_b, weight, bias,
                         input_noise, output_noise, stream_dtype=None):
    """Factorized-noise forward.

    x            : (B, In)
    linear_w     : (Out, In)   nn.Linear weight (native layout, no transpose)
    linear_b     : (Out,)
    weight       : (Out, In)   noisy-branch weight
    bias         : (Out,)
    input_noise  : (In,)       factorized noise (input factor)
    output_noise : (Out,)      factorized noise (output factor == bias_noise)
    stream_dtype : optional dtype (e.g. jnp.bfloat16) for the streamed
                   activations/weights; accumulation stays f32.
    returns      : (B, Out) in x.dtype
    """
    out_dtype = x.dtype
    sdt = jnp.dtype(stream_dtype) if stream_dtype is not None else jnp.dtype(x.dtype)

    B, In = x.shape
    Out = linear_w.shape[0]

    tm, Bp = _tile_and_pad(B, _TM_CAP)
    tn, Outp = _tile_and_pad(Out, _TN_CAP)
    tk, Inp = _tile_and_pad(In, _TK_CAP)

    # Megacore (v7x): make sure at least one parallel axis has >= 2 blocks.
    if Bp // tm == 1 and Outp // tn == 1:
        half = tm // 2
        if half >= 64 and half % 8 == 0 and Bp % half == 0:
            tm = half

    grid = (Bp // tm, Outp // tn, Inp // tk)
    fused = tm >= 256   # single-dot fusion only when compute-bound enough

    # Streamed operands (cast + zero-pad to tile multiples).
    xs = _pad_axis(_pad_axis(x.astype(sdt), 0, Bp), 1, Inp)
    lws = _pad_axis(_pad_axis(linear_w.astype(sdt), 0, Outp), 1, Inp)
    ws = _pad_axis(_pad_axis(weight.astype(sdt), 0, Outp), 1, Inp)
    in_n = _pad_axis(input_noise.reshape(1, In).astype(sdt), 1, Inp)

    out_n_f32 = output_noise.astype(jnp.float32)
    # Combined bias: linear.bias + bias * bias_noise, added only in epilogue.
    cbias = _pad_axis(
        (linear_b.astype(jnp.float32)
         + bias.astype(jnp.float32) * out_n_f32).reshape(1, Out), 1, Outp)

    itm_s = sdt.itemsize
    itm_o = jnp.dtype(out_dtype).itemsize
    acc_count = 1 if fused else 2
    vmem_bytes = 2 * (tm * tk + 2 * tn * tk + tk) * itm_s   # x, lw, w, in_noise (dbl-buffered)
    vmem_bytes += 2 * tn * (itm_s if fused else 4)          # out_noise col/row
    vmem_bytes += 2 * tn * 4                                # cbias
    vmem_bytes += 2 * tm * tn * itm_o                       # output tile
    vmem_bytes += acc_count * tm * tn * 4                   # accumulators

    common_specs = [
        pl.BlockSpec((tm, tk), lambda i, j, k: (i, k)),     # x
        pl.BlockSpec((tn, tk), lambda i, j, k: (j, k)),     # linear.weight
        pl.BlockSpec((tn, tk), lambda i, j, k: (j, k)),     # noisy weight
        pl.BlockSpec((1, tk), lambda i, j, k: (0, k)),      # input noise row
    ]
    if fused:
        kernel = _factorized_fused_kernel
        out_n_op = _pad_axis(out_n_f32.reshape(Out, 1).astype(sdt), 0, Outp)
        in_specs = common_specs + [
            pl.BlockSpec((tn, 1), lambda i, j, k: (j, 0)),  # output noise col
            pl.BlockSpec((1, tn), lambda i, j, k: (0, j)),  # combined bias
        ]
        scratch = [pltpu.VMEM((tm, tn), jnp.float32)]
    else:
        kernel = _factorized_split_kernel
        out_n_op = _pad_axis(out_n_f32.reshape(1, Out), 1, Outp)
        in_specs = common_specs + [
            pl.BlockSpec((1, tn), lambda i, j, k: (0, j)),  # output noise row
            pl.BlockSpec((1, tn), lambda i, j, k: (0, j)),  # combined bias
        ]
        scratch = [pltpu.VMEM((tm, tn), jnp.float32),
                   pltpu.VMEM((tm, tn), jnp.float32)]

    out_p = pl.pallas_call(
        kernel,
        out_shape=jax.ShapeDtypeStruct((Bp, Outp), out_dtype),
        grid_spec=pltpu.PrefetchScalarGridSpec(
            num_scalar_prefetch=0,
            grid=grid,
            in_specs=in_specs,
            out_specs=pl.BlockSpec((tm, tn), lambda i, j, k: (i, j)),
            scratch_shapes=scratch),
        compiler_params=pltpu.CompilerParams(
            dimension_semantics=("parallel", "parallel", "arbitrary"),
            vmem_limit_bytes=_vmem_limit(vmem_bytes)),
    )(xs, lws, ws, in_n, out_n_op, cbias)

    return out_p[:B, :Out]


# ---------------------------------------------------------------------------
# Non-factorized path (factorized=False): full (Out, In) weight-noise matrix.
# Single fused dot:  x @ (linear_w + weight * weight_noise).T
# ---------------------------------------------------------------------------
def _full_noise_kernel(x_ref, lw_ref, w_ref, wn_ref, cbias_ref, o_ref, acc_ref):
    k = pl.program_id(2)

    @pl.when(k == 0)
    def _():
        acc_ref[...] = jnp.zeros_like(acc_ref)

    combined = lw_ref[...] + w_ref[...] * wn_ref[...]
    acc_ref[...] += lax.dot_general(
        x_ref[...], combined, _CONTRACT_LAST, preferred_element_type=jnp.float32)

    @pl.when(k == pl.num_programs(2) - 1)
    def _():
        o_ref[...] = (acc_ref[...] + cbias_ref[...]).astype(o_ref.dtype)


@functools.partial(jax.jit, static_argnames=("stream_dtype",))
def noisy_linear_forward_full(x, linear_w, linear_b, weight, bias,
                              weight_noise, bias_noise, stream_dtype=None):
    """factorized=False forward: weight_noise is a full (Out, In) matrix."""
    out_dtype = x.dtype
    sdt = jnp.dtype(stream_dtype) if stream_dtype is not None else jnp.dtype(x.dtype)

    B, In = x.shape
    Out = linear_w.shape[0]

    tm, Bp = _tile_and_pad(B, _TM_CAP)
    tn, Outp = _tile_and_pad(Out, _TN_CAP)
    tk, Inp = _tile_and_pad(In, _TK_CAP)
    if Bp // tm == 1 and Outp // tn == 1:
        half = tm // 2
        if half >= 64 and half % 8 == 0 and Bp % half == 0:
            tm = half
    grid = (Bp // tm, Outp // tn, Inp // tk)

    xs = _pad_axis(_pad_axis(x.astype(sdt), 0, Bp), 1, Inp)
    lws = _pad_axis(_pad_axis(linear_w.astype(sdt), 0, Outp), 1, Inp)
    ws = _pad_axis(_pad_axis(weight.astype(sdt), 0, Outp), 1, Inp)
    wns = _pad_axis(_pad_axis(weight_noise.astype(sdt), 0, Outp), 1, Inp)

    cbias = _pad_axis(
        (linear_b.astype(jnp.float32)
         + bias.astype(jnp.float32) * bias_noise.astype(jnp.float32)
         ).reshape(1, Out), 1, Outp)

    itm_s = sdt.itemsize
    itm_o = jnp.dtype(out_dtype).itemsize
    vmem_bytes = 2 * (tm * tk + 3 * tn * tk) * itm_s       # x + 3 weight streams
    vmem_bytes += 2 * tn * 4                               # cbias
    vmem_bytes += 2 * tm * tn * itm_o + tm * tn * 4        # output + accumulator

    out_p = pl.pallas_call(
        _full_noise_kernel,
        out_shape=jax.ShapeDtypeStruct((Bp, Outp), out_dtype),
        grid_spec=pltpu.PrefetchScalarGridSpec(
            num_scalar_prefetch=0,
            grid=grid,
            in_specs=[
                pl.BlockSpec((tm, tk), lambda i, j, k: (i, k)),   # x
                pl.BlockSpec((tn, tk), lambda i, j, k: (j, k)),   # linear.weight
                pl.BlockSpec((tn, tk), lambda i, j, k: (j, k)),   # noisy weight
                pl.BlockSpec((tn, tk), lambda i, j, k: (j, k)),   # weight noise
                pl.BlockSpec((1, tn), lambda i, j, k: (0, j)),    # combined bias
            ],
            out_specs=pl.BlockSpec((tm, tn), lambda i, j, k: (i, j)),
            scratch_shapes=[pltpu.VMEM((tm, tn), jnp.float32)]),
        compiler_params=pltpu.CompilerParams(
            dimension_semantics=("parallel", "parallel", "arbitrary"),
            vmem_limit_bytes=_vmem_limit(vmem_bytes)),
    )(xs, lws, ws, wns, cbias)

    return out_p[:B, :Out]


# ---------------------------------------------------------------------------
# Plain-JAX glue mirroring the module (noise sampling & init).
# TODO(synk): torch's RNG stream cannot be reproduced bit-exactly; sampling is
# mirrored distributionally with jax.random.
# ---------------------------------------------------------------------------
def sample_factorized_noise(key, in_features, out_features, stddev=0.5):
    """Mirror of NoisyLinear.sample_noise (factorized=True) WITHOUT building
    the outer product: returns (input_noise, output_noise); bias_noise is
    output_noise.  (The source module uses plain Gaussians — no sign*sqrt.)"""
    k1, k2 = jax.random.split(key)
    output_noise = stddev * jax.random.normal(k1, (out_features,), jnp.float32)
    input_noise = stddev * jax.random.normal(k2, (in_features,), jnp.float32)
    return input_noise, output_noise


def sample_full_noise(key, in_features, out_features, stddev=0.5):
    """Mirror of NoisyLinear.sample_noise (factorized=False)."""
    k1, k2 = jax.random.split(key)
    weight_noise = stddev * jax.random.normal(
        k1, (out_features, in_features), jnp.float32)
    bias_noise = stddev * jax.random.normal(k2, (out_features,), jnp.float32)
    return weight_noise, bias_noise


def init_params(key, in_features, out_features):
    """uniform(-1/sqrt(fan_in), 1/sqrt(fan_in)) like nn.Linear / kaiming."""
    k1, k2, k3, k4 = jax.random.split(key, 4)
    bound = 1.0 / jnp.sqrt(jnp.float32(in_features))
    linear_w = jax.random.uniform(k1, (out_features, in_features),
                                  jnp.float32, -bound, bound)
    linear_b = jax.random.uniform(k2, (out_features,), jnp.float32,
                                  -bound, bound)
    weight = jax.random.uniform(k3, (out_features, in_features), jnp.float32,
                                -bound, bound)
    bias = jax.random.uniform(k4, (out_features,), jnp.float32, -bound, bound)
    return linear_w, linear_b, weight, bias


if __name__ == "__main__":
    B, IN_F, OUT_F = 8, 32, 128

    root = jax.random.PRNGKey(0)
    k_x, k_p, k_n, k_nf, k_x2 = jax.random.split(root, 5)

    x = jax.random.normal(k_x, (B, IN_F), jnp.float32)
    linear_w, linear_b, weight, bias = init_params(k_p, IN_F, OUT_F)

    # --- factorized path (module default), small batch -> split kernel ---
    input_noise, output_noise = sample_factorized_noise(k_n, IN_F, OUT_F, 0.5)
    out = noisy_linear_forward(x, linear_w, linear_b, weight, bias,
                               input_noise, output_noise)
    out = jax.block_until_ready(out)

    weight_noise_ref = output_noise[:, None] * input_noise[None, :]
    ref = (x @ linear_w.T + linear_b[None, :]
           + x @ (weight * weight_noise_ref).T
           + (bias * output_noise)[None, :])
    assert out.shape == (B, OUT_F)
    assert jnp.allclose(out, ref, atol=1e-4, rtol=1e-4), "factorized mismatch"

    # --- factorized path, larger batch -> fused single-dot kernel ---
    B2 = 512
    x2 = jax.random.normal(k_x2, (B2, IN_F), jnp.float32)
    out2 = jax.block_until_ready(
        noisy_linear_forward(x2, linear_w, linear_b, weight, bias,
                             input_noise, output_noise))
    ref2 = (x2 @ linear_w.T + linear_b[None, :]
            + x2 @ (weight * weight_noise_ref).T
            + (bias * output_noise)[None, :])
    assert out2.shape == (B2, OUT_F)
    assert jnp.allclose(out2, ref2, atol=1e-4, rtol=1e-4), "fused mismatch"

    # --- factorized path with bf16 streaming (f32 accumulation) ---
    out_bf = jax.block_until_ready(
        noisy_linear_forward(x, linear_w, linear_b, weight, bias,
                             input_noise, output_noise,
                             stream_dtype=jnp.bfloat16))
    assert jnp.allclose(out_bf, ref, atol=5e-2, rtol=5e-2), "bf16 mismatch"

    # --- non-factorized path (single fused dot on lw + w*wn) ---
    weight_noise, bias_noise = sample_full_noise(k_nf, IN_F, OUT_F, 0.5)
    out_full = jax.block_until_ready(
        noisy_linear_forward_full(x, linear_w, linear_b, weight, bias,
                                  weight_noise, bias_noise))
    ref_full = (x @ linear_w.T + linear_b[None, :]
                + x @ (weight * weight_noise).T
                + (bias * bias_noise)[None, :])
    assert jnp.allclose(out_full, ref_full, atol=1e-4, rtol=1e-4), \
        "full-noise mismatch"

    print("KERNEL_OK")
</pallas_src>

<mosaic_0001>
module attributes {stable_mosaic.version = 11 : i64} {
  func.func @_factorized_split_kernel(%arg0: i32, %arg1: i32, %arg2: i32, %arg3: memref<8x32xf32, #tpu.memory_space<vmem>>, %arg4: memref<128x32xf32, #tpu.memory_space<vmem>>, %arg5: memref<128x32xf32, #tpu.memory_space<vmem>>, %arg6: memref<1x32xf32, #tpu.memory_space<vmem>>, %arg7: memref<1x128xf32, #tpu.memory_space<vmem>>, %arg8: memref<1x128xf32, #tpu.memory_space<vmem>>, %arg9: memref<8x128xf32, #tpu.memory_space<vmem>>, %arg10: memref<8x128xf32, #tpu.memory_space<vmem>>, %arg11: memref<8x128xf32, #tpu.memory_space<vmem>>) attributes {dimension_semantics = [#tpu.dimension_semantics<parallel>, #tpu.dimension_semantics<parallel>, #tpu.dimension_semantics<arbitrary>], iteration_bounds = array<i64: 1, 1, 1>, scalar_prefetch = 0 : i64, scratch_operands = 2 : i64, tpu.core_type = #tpu.core_type<tc>, window_params = [{transform_indices = @transform_0, window_bounds = array<i64: 8, 32>}, {transform_indices = @transform_1, window_bounds = array<i64: 128, 32>}, {transform_indices = @transform_2, window_bounds = array<i64: 128, 32>}, {transform_indices = @transform_3, window_bounds = array<i64: 1, 32>}, {transform_indices = @transform_4, window_bounds = array<i64: 1, 128>}, {transform_indices = @transform_5, window_bounds = array<i64: 1, 128>}, {transform_indices = @transform_6, window_bounds = array<i64: 8, 128>}]} {
    %c0_i32 = arith.constant 0 : i32
    %0 = arith.cmpi eq, %arg2, %c0_i32 : i32
    %1 = arith.extui %0 : i1 to i32
    %c0_i32_0 = arith.constant 0 : i32
    %2 = arith.cmpi ne, %1, %c0_i32_0 : i32
    scf.if %2 {
      %cst_19 = arith.constant 0.000000e+00 : f32
      %20 = vector.broadcast %cst_19 : f32 to vector<8x128xf32>
      %c0_20 = arith.constant 0 : index
      %c0_21 = arith.constant 0 : index
      %21 = vector.load %arg10[%c0_20, %c0_21] : memref<8x128xf32, #tpu.memory_space<vmem>>, vector<8x128xf32>
      tpu.vector_store %arg10[%c0_20, %c0_21], %20 {strides = array<i32>} : memref<8x128xf32, #tpu.memory_space<vmem>>, vector<8x128xf32>,
      %cst_22 = arith.constant 0.000000e+00 : f32
      %22 = vector.broadcast %cst_22 : f32 to vector<8x128xf32>
      %c0_23 = arith.constant 0 : index
      %c0_24 = arith.constant 0 : index
      %23 = vector.load %arg11[%c0_23, %c0_24] : memref<8x128xf32, #tpu.memory_space<vmem>>, vector<8x128xf32>
      tpu.vector_store %arg11[%c0_23, %c0_24], %22 {strides = array<i32>} : memref<8x128xf32, #tpu.memory_space<vmem>>, vector<8x128xf32>,
    } else {
    }
    %c0 = arith.constant 0 : index
    %c0_1 = arith.constant 0 : index
    %3 = vector.load %arg3[%c0, %c0_1] : memref<8x32xf32, #tpu.memory_space<vmem>>, vector<8x32xf32>
    %c0_2 = arith.constant 0 : index
    %c0_3 = arith.constant 0 : index
    %4 = vector.load %arg10[%c0_2, %c0_3] : memref<8x128xf32, #tpu.memory_space<vmem>>, vector<8x128xf32>
    %c0_4 = arith.constant 0 : index
    %c0_5 = arith.constant 0 : index
    %5 = vector.load %arg4[%c0_4, %c0_5] : memref<128x32xf32, #tpu.memory_space<vmem>>, vector<128x32xf32>
    %cst = arith.constant dense<0.000000e+00> : vector<8x128xf32>
    %6 = tpu.matmul %3, %5, %cst {dimension_numbers = #tpu.dot_dimension_numbers<[1], [1], [0], [0], [0, 0, 1, 0], [], []>} : vector<8x32xf32>, vector<128x32xf32>, vector<8x128xf32> -> vector<8x128xf32>
    %7 = arith.addf %4, %6 : vector<8x128xf32>
    %c0_6 = arith.constant 0 : index
    %c0_7 = arith.constant 0 : index
    %8 = vector.load %arg10[%c0_6, %c0_7] : memref<8x128xf32, #tpu.memory_space<vmem>>, vector<8x128xf32>
    tpu.vector_store %arg10[%c0_6, %c0_7], %7 {strides = array<i32>} : memref<8x128xf32, #tpu.memory_space<vmem>>, vector<8x128xf32>,
    %c0_8 = arith.constant 0 : index
    %c0_9 = arith.constant 0 : index
    %9 = vector.load %arg6[%c0_8, %c0_9] : memref<1x32xf32, #tpu.memory_space<vmem>>, vector<1x32xf32>
    %10 = vector.broadcast %9 : vector<1x32xf32> to vector<8x32xf32>
    %11 = arith.mulf %3, %10 : vector<8x32xf32>
    %c0_10 = arith.constant 0 : index
    %c0_11 = arith.constant 0 : index
    %12 = vector.load %arg11[%c0_10, %c0_11] : memref<8x128xf32, #tpu.memory_space<vmem>>, vector<8x128xf32>
    %c0_12 = arith.constant 0 : index
    %c0_13 = arith.constant 0 : index
    %13 = vector.load %arg5[%c0_12, %c0_13] : memref<128x32xf32, #tpu.memory_space<vmem>>, vector<128x32xf32>
    %cst_14 = arith.constant dense<0.000000e+00> : vector<8x128xf32>
    %14 = tpu.matmul %11, %13, %cst_14 {dimension_numbers = #tpu.dot_dimension_numbers<[1], [1], [0], [0], [0, 0, 1, 0], [], []>} : vector<8x32xf32>, vector<128x32xf32>, vector<8x128xf32> -> vector<8x128xf32>
    %15 = arith.addf %12, %14 : vector<8x128xf32>
    %c0_15 = arith.constant 0 : index
    %c0_16 = arith.constant 0 : index
    %16 = vector.load %arg11[%c0_15, %c0_16] : memref<8x128xf32, #tpu.memory_space<vmem>>, vector<8x128xf32>
    tpu.vector_store %arg11[%c0_15, %c0_16], %15 {strides = array<i32>} : memref<8x128xf32, #tpu.memory_space<vmem>>, vector<8x128xf32>,
    %c0_i32_17 = arith.constant 0 : i32
    %17 = arith.cmpi eq, %arg2, %c0_i32_17 : i32
    %18 = arith.extui %17 : i1 to i32
    %c0_i32_18 = arith.constant 0 : i32
    %19 = arith.cmpi ne, %18, %c0_i32_18 : i32
    scf.if %19 {
      %c0_19 = arith.constant 0 : index
      %c0_20 = arith.constant 0 : index
      %20 = vector.load %arg10[%c0_19, %c0_20] : memref<8x128xf32, #tpu.memory_space<vmem>>, vector<8x128xf32>
      %c0_21 = arith.constant 0 : index
      %c0_22 = arith.constant 0 : index
      %21 = vector.load %arg11[%c0_21, %c0_22] : memref<8x128xf32, #tpu.memory_space<vmem>>, vector<8x128xf32>
      %c0_23 = arith.constant 0 : index
      %c0_24 = arith.constant 0 : index
      %22 = vector.load %arg7[%c0_23, %c0_24] : memref<1x128xf32, #tpu.memory_space<vmem>>, vector<1x128xf32>
      %23 = vector.broadcast %22 : vector<1x128xf32> to vector<8x128xf32>
      %24 = arith.mulf %21, %23 : vector<8x128xf32>
      %25 = arith.addf %20, %24 : vector<8x128xf32>
      %c0_25 = arith.constant 0 : index
      %c0_26 = arith.constant 0 : index
      %26 = vector.load %arg8[%c0_25, %c0_26] : memref<1x128xf32, #tpu.memory_space<vmem>>, vector<1x128xf32>
      %27 = vector.broadcast %26 : vector<1x128xf32> to vector<8x128xf32>
      %28 = arith.addf %25, %27 : vector<8x128xf32>
      %c0_27 = arith.constant 0 : index
      %c0_28 = arith.constant 0 : index
      %29 = vector.load %arg9[%c0_27, %c0_28] : memref<8x128xf32, #tpu.memory_space<vmem>>, vector<8x128xf32>
      tpu.vector_store %arg9[%c0_27, %c0_28], %28 {strides = array<i32>} : memref<8x128xf32, #tpu.memory_space<vmem>>, vector<8x128xf32>,
    } else {
    }
    return
  }
  func.func @transform_0(%arg0: i32, %arg1: i32, %arg2: i32) -> (i32, i32) {
    %c0_i32 = arith.constant 0 : i32
    return %arg0, %arg2 : i32, i32
  }
  func.func @transform_1(%arg0: i32, %arg1: i32, %arg2: i32) -> (i32, i32) {
    %c0_i32 = arith.constant 0 : i32
    return %arg1, %arg2 : i32, i32
  }
  func.func @transform_2(%arg0: i32, %arg1: i32, %arg2: i32) -> (i32, i32) {
    %c0_i32 = arith.constant 0 : i32
    return %arg1, %arg2 : i32, i32
  }
  func.func @transform_3(%arg0: i32, %arg1: i32, %arg2: i32) -> (i32, i32) {
    %c0_i32 = arith.constant 0 : i32
    %c0_i32_0 = arith.constant 0 : i32
    return %c0_i32, %arg2 : i32, i32
  }
  func.func @transform_4(%arg0: i32, %arg1: i32, %arg2: i32) -> (i32, i32) {
    %c0_i32 = arith.constant 0 : i32
    %c0_i32_0 = arith.constant 0 : i32
    return %c0_i32, %arg1 : i32, i32
  }
  func.func @transform_5(%arg0: i32, %arg1: i32, %arg2: i32) -> (i32, i32) {
    %c0_i32 = arith.constant 0 : i32
    %c0_i32_0 = arith.constant 0 : i32
    return %c0_i32, %arg1 : i32, i32
  }
  func.func @transform_6(%arg0: i32, %arg1: i32, %arg2: i32) -> (i32, i32) {
    %c0_i32 = arith.constant 0 : i32
    return %arg0, %arg1 : i32, i32
  }
}

</mosaic_0001>

<bundles_post_ra>
// kernel: noisy_linear_forward.1
= control target key start
LH: loop header
LB: loop body
LE: loop exit
PB: predicated region body
PF: predicated region fallthrough
CT: control target
= control target key end

     0   :  { %vm48_vm0 = vcmask 261120   ;;  %v590_v3 = vmov 0.0|0.0   ;;  %vm591_vm2 = vmmov 0   ;;  %v592_v8 = vmov 0.0   ;;  %s805_s0 = inlined_call_operand.vmem [shape: f32[8,32], index: 0, kind: input, shape index: {}]   ;;  %s806_s1 = inlined_call_operand.vmem [shape: f32[128,32], index: 1, kind: input, shape index: {}]   ;;  %s807_s2 = inlined_call_operand.vmem [shape: f32[128,32], index: 2, kind: input, shape index: {}]   ;;  %s808_s3 = inlined_call_operand.vmem [shape: f32[1,32], index: 3, kind: input, shape index: {}]   ;;  %s809_s4 = inlined_call_operand.vmem [shape: f32[1,128], index: 4, kind: input, shape index: {}]   ;;  %s810_s5 = inlined_call_operand.vmem [shape: f32[1,128], index: 5, kind: input, shape index: {}]   ;;  %s811_s6 = inlined_call_operand.hbm [shape: f32[8,128], index: 6, kind: output, shape index: {}]  }
   0x1   :  { %v181_v0 = vld [vmem:[%s807_s2] sm:$0xff]  ;;  %v182_v1 = vld [vmem:[%s807_s2 + $0x8] sm:$0xff]  ;;  %530 = vmatprep.subr.bf16.mxu1 %v590_v3  ;;  %498 = vmatprep.subr.bf16.mxu0 %v590_v3  ;;  %vm642_vm1 = vmpackc.low %vm48_vm0, %vm48_vm0 }
   0x2   :  { %v32_v2 = vld [vmem:[%s806_s1] sm:$0xff]  ;;  %v531_v5 = vpack.c.bf16 %v182_v1, %v181_v0  ;;  %v33_v6 = vld [vmem:[%s806_s1 + $0x8] sm:$0xff]  ;;  %495 = vmatprep.mubr.msk.f32.mxu1 %vm591_vm2, %v592_v8  ;;  %460 = vmatprep.mubr.msk.f32.mxu0 %vm591_vm2, %v592_v8  ;;  %v183_v9 = vld [vmem:[%s807_s2 + $0x10] sm:$0xff] }
   0x3   :  { %v499_v7 = vpack.c.bf16 %v33_v6, %v32_v2  ;;  %v184_v10 = vld [vmem:[%s807_s2 + $0x18] sm:$0xff]  ;;  %v34_v11 = vld [vmem:[%s806_s1 + $0x10] sm:$0xff] }
   0x4   :  { %533 = vmatpush3.bf16.xpose.msk.msra.mxu1 %vm642_vm1, %v531_v5  ;;  %v35_v12 = vld [vmem:[%s806_s1 + $0x18] sm:$0xff]  ;;  %v535_v13 = vpack.c.bf16 %v184_v10, %v183_v9 }
   0x5   :  { %501 = vmatpush3.bf16.xpose.msk.msra.mxu0 %vm642_vm1, %v499_v7  ;;  %534 = vmatprep.subr.bf16.mxu1 %v590_v3  ;;  %v503_v14 = vpack.c.bf16 %v35_v12, %v34_v11 }
   0x6   :  { %502 = vmatprep.subr.bf16.mxu0 %v590_v3 }
   0xc   :  { %537 = vmatpush3.bf16.xpose.msk.msra.mxu1 %vm642_vm1, %v535_v13 }
   0xd   :  { %11 = vsyncpa [#allocation5], 0  ;;  %505 = vmatpush3.bf16.xpose.msk.msra.mxu0 %vm642_vm1, %v503_v14  ;;  %538 = vmatprep.subr.bf16.mxu1 %v590_v3  ;;  %v185_v15 = vld [vmem:[%s807_s2 + $0x20] sm:$0xff]  ;;  %v186_v16 = vld [vmem:[%s807_s2 + $0x28] sm:$0xff] }
   0xe   :  { %506 = vmatprep.subr.bf16.mxu0 %v590_v3  ;;  %v36_v17 = vld [vmem:[%s806_s1 + $0x20] sm:$0xff]  ;;  %v37_v18 = vld [vmem:[%s806_s1 + $0x28] sm:$0xff]  ;;  %v539_v19 = vpack.c.bf16 %v186_v16, %v185_v15  ;;  %v187_v21 = vld [vmem:[%s807_s2 + $0x30] sm:$0xff] }
   0xf   :  { %v507_v20 = vpack.c.bf16 %v37_v18, %v36_v17  ;;  %v188_v22 = vld [vmem:[%s807_s2 + $0x38] sm:$0xff]  ;;  %v38_v23 = vld [vmem:[%s806_s1 + $0x30] sm:$0xff]  ;;  %v189_v27 = vld [vmem:[%s807_s2 + $0x40] sm:$0xff] }
  0x10   :  { %v39_v24 = vld [vmem:[%s806_s1 + $0x38] sm:$0xff]  ;;  %v543_v25 = vpack.c.bf16 %v188_v22, %v187_v21  ;;  %v190_v28 = vld [vmem:[%s807_s2 + $0x48] sm:$0xff]  ;;  %v40_v29 = vld [vmem:[%s806_s1 + $0x40] sm:$0xff] }
  0x11   :  { %v511_v26 = vpack.c.bf16 %v39_v24, %v38_v23  ;;  %v41_v30 = vld [vmem:[%s806_s1 + $0x48] sm:$0xff]  ;;  %v547_v31 = vpack.c.bf16 %v190_v28, %v189_v27  ;;  %v191_v33 = vld [vmem:[%s807_s2 + $0x50] sm:$0xff]  ;;  %v192_v34 = vld [vmem:[%s807_s2 + $0x58] sm:$0xff] }
  0x12   :  { %v515_v32 = vpack.c.bf16 %v41_v30, %v40_v29  ;;  %v42_v35 = vld [vmem:[%s806_s1 + $0x50] sm:$0xff]  ;;  %v43_v36 = vld [vmem:[%s806_s1 + $0x58] sm:$0xff]  ;;  %v551_v37 = vpack.c.bf16 %v192_v34, %v191_v33  ;;  %v193_v39 = vld [vmem:[%s807_s2 + $0x60] sm:$0xff] }
  0x13   :  { %v519_v38 = vpack.c.bf16 %v43_v36, %v42_v35  ;;  %v194_v40 = vld [vmem:[%s807_s2 + $0x68] sm:$0xff]  ;;  %v44_v41 = vld [vmem:[%s806_s1 + $0x60] sm:$0xff]  ;;  %v195_v45 = vld [vmem:[%s807_s2 + $0x70] sm:$0xff] }
  0x14   :  { %541 = vmatpush3.bf16.xpose.msk.msra.mxu1 %vm642_vm1, %v539_v19  ;;  %v45_v42 = vld [vmem:[%s806_s1 + $0x68] sm:$0xff]  ;;  %v555_v43 = vpack.c.bf16 %v194_v40, %v193_v39  ;;  %v196_v46 = vld [vmem:[%s807_s2 + $0x78] sm:$0xff]  ;;  %v46_v47 = vld [vmem:[%s806_s1 + $0x70] sm:$0xff] }
  0x15   :  { %509 = vmatpush3.bf16.xpose.msk.msra.mxu0 %vm642_vm1, %v507_v20  ;;  %542 = vmatprep.subr.bf16.mxu1 %v590_v3  ;;  %v523_v44 = vpack.c.bf16 %v45_v42, %v44_v41  ;;  %v47_v48 = vld [vmem:[%s806_s1 + $0x78] sm:$0xff]  ;;  %v559_v49 = vpack.c.bf16 %v196_v46, %v195_v45  ;;  %v30_v51 = vld [vmem:[%s805_s0] sm:$0xff] }
  0x16   :  { %510 = vmatprep.subr.bf16.mxu0 %v590_v3  ;;  %v527_v50 = vpack.c.bf16 %v47_v48, %v46_v47  ;;  %v374_v52 = vld [vmem:[%s808_s3] ss:$0 sm:$0xff]  ;;  %s593_s3 = smov [#allocation4]  }
  0x17   :  { %v179_v53 = vmul.f32 %v374_v52, %v30_v51  ;;  %v392_v54 = vld [vmem:[%s809_s4] ss:$0 sm:$0xff]  ;;  %s349_s18 = sshll.u32 %s593_s3, 4  ;;  %s350_s18 = int_to_ptr.vmem [resolvable:$true] %s349_s18 }
  0x18   :  { %v393_v60 = vld [vmem:[%s810_s5] ss:$0 sm:$0xff]  ;;  %s566_s19 = scalar_lea.vmem %s350_s18, 128  ;;  %p571_p1 = scmp.lt.s32.totalorder %s350_s18, %s350_s18 }
  0x19   :  { %p567_p0 = scmp.ne.s32.totalorder %s350_s18, %s566_s19  ;;  %p572_p2 = scmp.lt.s32.totalorder %s566_s19, %s566_s19 }
  0x1b   :  { %p573_p3 = por %p572_p2, %p571_p1 }
  0x1c   :  { %545 = vmatpush3.bf16.xpose.msk.msra.mxu1 %vm642_vm1, %v543_v25 }
  0x1d   :  { %513 = vmatpush3.bf16.xpose.msk.msra.mxu0 %vm642_vm1, %v511_v26  ;;  %546 = vmatprep.subr.bf16.mxu1 %v590_v3  ;;  %p574_p4 = pnand %p573_p3, %p567_p0 }
  0x1e   :  { %514 = vmatprep.subr.bf16.mxu0 %v590_v3 }
  0x24   :  { %549 = vmatpush3.bf16.xpose.msk.msra.mxu1 %vm642_vm1, %v547_v31 }
  0x25   :  { %517 = vmatpush3.bf16.xpose.msk.msra.mxu0 %vm642_vm1, %v515_v32  ;;  %550 = vmatprep.subr.bf16.mxu1 %v590_v3 }
  0x26   :  { %518 = vmatprep.subr.bf16.mxu0 %v590_v3 }
  0x2c   :  { %553 = vmatpush3.bf16.xpose.msk.msra.mxu1 %vm642_vm1, %v551_v37 }
  0x2d   :  { %521 = vmatpush3.bf16.xpose.msk.msra.mxu0 %vm642_vm1, %v519_v38  ;;  %554 = vmatprep.subr.bf16.mxu1 %v590_v3 }
  0x2e   :  { %522 = vmatprep.subr.bf16.mxu0 %v590_v3 }
  0x34   :  { %557 = vmatpush3.bf16.xpose.msk.msra.mxu1 %vm642_vm1, %v555_v43 }
  0x35   :  { %525 = vmatpush3.bf16.xpose.msk.msra.mxu0 %vm642_vm1, %v523_v44  ;;  %558 = vmatprep.subr.bf16.mxu1 %v590_v3 }
  0x36   :  { %526 = vmatprep.subr.bf16.mxu0 %v590_v3 }
  0x3c   :  { %561 = vmatpush3.bf16.xpose.msk.msra.mxu1 %vm642_vm1, %v559_v49 }
  0x3d   :  { %529 = vmatpush3.bf16.xpose.msk.msra.mxu0 %vm642_vm1, %v527_v50 }
  0x43   :  { %496 = vmatmul.mubr.msk.f32.vlgmr.msra.gmra.mrb[0].mxu1 %vm48_vm0, %v179_v53 }
  0x44   :  { %461 = vmatmul.mubr.msk.f32.vlgmr.msra.gmra.mrb[0].mxu0 %vm48_vm0, %v30_v51 }
 0x116   :  { %v314_v55 = vpop.f32.mrb[0].mxu1 }
 0x117   :  { %v332_v56 = vmul.f32 %v392_v54, %v314_v55  ;;  %v166_v57 = vpop.f32.mrb[0].mxu0  ;;  %v497_v58 = vpop.f32.mrb[1].mxu1 }
 0x118   :  { %v462_v59 = vpop.f32.mrb[1].mxu0 }
 0x119   :  { %v333_v61 = vadd.f32 %v332_v56, %v166_v57 }
 0x11b   :  { %v341_v62 = vadd.f32 %v393_v60, %v333_v61 }
 0x11d   :  { %342 = vst [vmem:[#allocation4] sm:$0xff] %v341_v62 }
 0x11e   :  { %577 = shalt.err (!%p574_p4)
}
 0x11f   :  { %s578_s21 = scalar_lea.hbm %s811_s6, 128 }
 0x120   :  { %p579_p5 = scmp.ne.s32.totalorder %s811_s6, %s578_s21  ;;  %p582_p6 = scmp.lt.u32.totalorder %s578_s21, %s811_s6 }
 0x122   :  { %p584_p7 = pnand %p582_p6, %p579_p5 }
 0x124   :  { %587 = shalt.err (!%p584_p7)
}
 0x125   :  { %352 = dma.vmem_to_hbm [thread:$0]  %s350_s18, 128, %s811_s6, [#allocation5]  }
 0x126   :  { %588 = dma.done.wait [#allocation5], 128  }
 0x127   :  { %589 = vsyncadd [#allocation5], 4294967168 }
 0x128   :  { %356 = vsyncpa [#allocation5], 1 }

</bundles_post_ra>
